<compile_context>
chip_gen: v7x
topology: tpu7x:2x2x1
jax: 0.10.0
libtpu: 0.0.40
codegen_flags: <defaults>
</compile_context>

<pallas_src>
import functools

import jax
import jax.numpy as jnp
from jax import lax
from jax.experimental import pallas as pl
from jax.experimental.pallas import tpu as pltpu


def _patches_kernel(x_ref, o_ref, *, patch_size, channels, hp, wp):
    """Patch extraction for a block of `bb` images.

    x_ref: (bb, C, H, W) VMEM tile.
    o_ref: (bb, num_patches, C*P*P) VMEM tile.
    """
    P = patch_size
    C = channels

    def per_patch_row(ph, carry):
        # One iteration handles all `wp` patches of patch-row `ph`,
        # writing each finished (bb, patch_dim) row directly into o_ref.
        for pw in range(wp):
            pieces = []
            for c in range(C):
                for i in range(P):
                    # (bb, P) lane strip: channel c, image row ph*P+i,
                    # columns of patch pw.
                    pieces.append(
                        x_ref[:, c, ph * P + i, pw * P:(pw + 1) * P]
                    )
            # Feature axis ordered (channel, patch_row, patch_col).
            row = jnp.concatenate(pieces, axis=-1)            # (bb, C*P*P)
            o_ref[:, ph * wp + pw, :] = row.astype(o_ref.dtype)
        return carry

    lax.fori_loop(0, hp, per_patch_row, 0)


def _round_up(x, m):
    return -(-x // m) * m


def _pick_batch_block(B, C, H, W, num_patches, patch_dim, itemsize,
                      budget_bytes=4 * 1024 * 1024):
    """Largest divisor of B whose padded in+out VMEM tile fits the budget,
    capped so the grid has at least two steps (lets v7x's two TCs both work)."""
    in_bytes = C * _round_up(H, 8) * _round_up(W, 128) * itemsize
    out_bytes = _round_up(num_patches, 8) * _round_up(patch_dim, 128) * itemsize
    per_image = in_bytes + out_bytes
    cap = max(1, B // 2)
    bb = 1
    for d in range(1, B + 1):
        if B % d == 0 and d <= cap and d * per_image <= budget_bytes:
            bb = d
    return bb


def patches(images, patch_size):
    """Pallas equivalent of Patches(patch_size, num_patches).forward(images)."""
    B, C, H, W = images.shape
    assert H % patch_size == 0 and W % patch_size == 0
    hp, wp = H // patch_size, W // patch_size
    num_patches = hp * wp
    patch_dim = C * patch_size * patch_size

    bb = _pick_batch_block(
        B, C, H, W, num_patches, patch_dim, images.dtype.itemsize
    )
    grid = (B // bb,)

    kernel = functools.partial(
        _patches_kernel, patch_size=patch_size, channels=C, hp=hp, wp=wp
    )

    return pl.pallas_call(
        kernel,
        out_shape=jax.ShapeDtypeStruct((B, num_patches, patch_dim), images.dtype),
        grid=grid,
        in_specs=[
            pl.BlockSpec((bb, C, H, W), lambda b: (b, 0, 0, 0)),
        ],
        out_specs=pl.BlockSpec(
            (bb, num_patches, patch_dim), lambda b: (b, 0, 0)
        ),
        compiler_params=pltpu.CompilerParams(
            dimension_semantics=("parallel",),
            vmem_limit_bytes=32 * 1024 * 1024,
        ),
    )(images)


def patches_ref(images, patch_size):
    """Pure-JAX reference mirroring the PyTorch unfold/permute/reshape."""
    B, C, H, W = images.shape
    hp, wp = H // patch_size, W // patch_size
    x = images.reshape(B, C, hp, patch_size, wp, patch_size)
    x = jnp.transpose(x, (0, 2, 4, 1, 3, 5))  # (B, hp, wp, C, P, P)
    return x.reshape(B, hp * wp, C * patch_size * patch_size)


if __name__ == "__main__":
    key = jax.random.PRNGKey(0)
    B, C, H, W = 2, 4, 16, 16
    patch_size = 4
    num_patches = (H // patch_size) * (W // patch_size)

    images = jax.random.normal(key, (B, C, H, W), dtype=jnp.float32)

    out = patches(images, patch_size)
    out = jax.block_until_ready(out)

    expected = patches_ref(images, patch_size)
    assert out.shape == (B, num_patches, C * patch_size * patch_size), out.shape
    assert jnp.allclose(out, expected), "Pallas output mismatch vs reference"
    print("KERNEL_OK")
</pallas_src>

<mosaic_0001>
module attributes {stable_mosaic.version = 11 : i64} {
  func.func @_patches_kernel(%arg0: i32, %arg1: memref<1x4x16x16xf32, #tpu.memory_space<vmem>>, %arg2: memref<1x16x64xf32, #tpu.memory_space<vmem>>) attributes {dimension_semantics = [#tpu.dimension_semantics<parallel>], iteration_bounds = array<i64: 2>, scalar_prefetch = 0 : i64, scratch_operands = 0 : i64, tpu.core_type = #tpu.core_type<tc>, window_params = [{transform_indices = @transform_0, window_bounds = array<i64: 1, 4, 16, 16>}, {transform_indices = @transform_1, window_bounds = array<i64: 1, 16, 64>}]} {
    %c0_i32 = arith.constant 0 : i32
    %c4_i32 = arith.constant 4 : i32
    %0 = arith.addi %c0_i32, %c4_i32 : i32
    %c1_i32 = arith.constant 1 : i32
    scf.for %arg3 = %c0_i32 to %0 step %c1_i32  : i32 {
      %c4_i32_1 = arith.constant 4 : i32
      %1 = arith.muli %arg3, %c4_i32_1 : i32
      %c0_i32_2 = arith.constant 0 : i32
      %2 = arith.addi %1, %c0_i32_2 : i32
      %c0 = arith.constant 0 : index
      %c0_3 = arith.constant 0 : index
      %3 = arith.index_cast %2 : i32 to index
      %c0_4 = arith.constant 0 : index
      %4 = vector.load %arg1[%c0, %c0_3, %3, %c0_4] : memref<1x4x16x16xf32, #tpu.memory_space<vmem>>, vector<1x1x1x4xf32>
      %5 = vector.shape_cast %4 : vector<1x1x1x4xf32> to vector<1x4xf32>
      %c4_i32_5 = arith.constant 4 : i32
      %6 = arith.muli %arg3, %c4_i32_5 : i32
      %c1_i32_6 = arith.constant 1 : i32
      %7 = arith.addi %6, %c1_i32_6 : i32
      %c0_7 = arith.constant 0 : index
      %c0_8 = arith.constant 0 : index
      %8 = arith.index_cast %7 : i32 to index
      %c0_9 = arith.constant 0 : index
      %9 = vector.load %arg1[%c0_7, %c0_8, %8, %c0_9] : memref<1x4x16x16xf32, #tpu.memory_space<vmem>>, vector<1x1x1x4xf32>
      %10 = vector.shape_cast %9 : vector<1x1x1x4xf32> to vector<1x4xf32>
      %c4_i32_10 = arith.constant 4 : i32
      %11 = arith.muli %arg3, %c4_i32_10 : i32
      %c2_i32 = arith.constant 2 : i32
      %12 = arith.addi %11, %c2_i32 : i32
      %c0_11 = arith.constant 0 : index
      %c0_12 = arith.constant 0 : index
      %13 = arith.index_cast %12 : i32 to index
      %c0_13 = arith.constant 0 : index
      %14 = vector.load %arg1[%c0_11, %c0_12, %13, %c0_13] : memref<1x4x16x16xf32, #tpu.memory_space<vmem>>, vector<1x1x1x4xf32>
      %15 = vector.shape_cast %14 : vector<1x1x1x4xf32> to vector<1x4xf32>
      %c4_i32_14 = arith.constant 4 : i32
      %16 = arith.muli %arg3, %c4_i32_14 : i32
      %c3_i32 = arith.constant 3 : i32
      %17 = arith.addi %16, %c3_i32 : i32
      %c0_15 = arith.constant 0 : index
      %c0_16 = arith.constant 0 : index
      %18 = arith.index_cast %17 : i32 to index
      %c0_17 = arith.constant 0 : index
      %19 = vector.load %arg1[%c0_15, %c0_16, %18, %c0_17] : memref<1x4x16x16xf32, #tpu.memory_space<vmem>>, vector<1x1x1x4xf32>
      %20 = vector.shape_cast %19 : vector<1x1x1x4xf32> to vector<1x4xf32>
      %c4_i32_18 = arith.constant 4 : i32
      %21 = arith.muli %arg3, %c4_i32_18 : i32
      %c0_i32_19 = arith.constant 0 : i32
      %22 = arith.addi %21, %c0_i32_19 : i32
      %c0_20 = arith.constant 0 : index
      %c1 = arith.constant 1 : index
      %23 = arith.index_cast %22 : i32 to index
      %c0_21 = arith.constant 0 : index
      %24 = vector.load %arg1[%c0_20, %c1, %23, %c0_21] : memref<1x4x16x16xf32, #tpu.memory_space<vmem>>, vector<1x1x1x4xf32>
      %25 = vector.shape_cast %24 : vector<1x1x1x4xf32> to vector<1x4xf32>
      %c4_i32_22 = arith.constant 4 : i32
      %26 = arith.muli %arg3, %c4_i32_22 : i32
      %c1_i32_23 = arith.constant 1 : i32
      %27 = arith.addi %26, %c1_i32_23 : i32
      %c0_24 = arith.constant 0 : index
      %c1_25 = arith.constant 1 : index
      %28 = arith.index_cast %27 : i32 to index
      %c0_26 = arith.constant 0 : index
      %29 = vector.load %arg1[%c0_24, %c1_25, %28, %c0_26] : memref<1x4x16x16xf32, #tpu.memory_space<vmem>>, vector<1x1x1x4xf32>
      %30 = vector.shape_cast %29 : vector<1x1x1x4xf32> to vector<1x4xf32>
      %c4_i32_27 = arith.constant 4 : i32
      %31 = arith.muli %arg3, %c4_i32_27 : i32
      %c2_i32_28 = arith.constant 2 : i32
      %32 = arith.addi %31, %c2_i32_28 : i32
      %c0_29 = arith.constant 0 : index
      %c1_30 = arith.constant 1 : index
      %33 = arith.index_cast %32 : i32 to index
      %c0_31 = arith.constant 0 : index
      %34 = vector.load %arg1[%c0_29, %c1_30, %33, %c0_31] : memref<1x4x16x16xf32, #tpu.memory_space<vmem>>, vector<1x1x1x4xf32>
      %35 = vector.shape_cast %34 : vector<1x1x1x4xf32> to vector<1x4xf32>
      %c4_i32_32 = arith.constant 4 : i32
      %36 = arith.muli %arg3, %c4_i32_32 : i32
      %c3_i32_33 = arith.constant 3 : i32
      %37 = arith.addi %36, %c3_i32_33 : i32
      %c0_34 = arith.constant 0 : index
      %c1_35 = arith.constant 1 : index
      %38 = arith.index_cast %37 : i32 to index
      %c0_36 = arith.constant 0 : index
      %39 = vector.load %arg1[%c0_34, %c1_35, %38, %c0_36] : memref<1x4x16x16xf32, #tpu.memory_space<vmem>>, vector<1x1x1x4xf32>
      %40 = vector.shape_cast %39 : vector<1x1x1x4xf32> to vector<1x4xf32>
      %c4_i32_37 = arith.constant 4 : i32
      %41 = arith.muli %arg3, %c4_i32_37 : i32
      %c0_i32_38 = arith.constant 0 : i32
      %42 = arith.addi %41, %c0_i32_38 : i32
      %c0_39 = arith.constant 0 : index
      %c2 = arith.constant 2 : index
      %43 = arith.index_cast %42 : i32 to index
      %c0_40 = arith.constant 0 : index
      %44 = vector.load %arg1[%c0_39, %c2, %43, %c0_40] : memref<1x4x16x16xf32, #tpu.memory_space<vmem>>, vector<1x1x1x4xf32>
      %45 = vector.shape_cast %44 : vector<1x1x1x4xf32> to vector<1x4xf32>
      %c4_i32_41 = arith.constant 4 : i32
      %46 = arith.muli %arg3, %c4_i32_41 : i32
      %c1_i32_42 = arith.constant 1 : i32
      %47 = arith.addi %46, %c1_i32_42 : i32
      %c0_43 = arith.constant 0 : index
      %c2_44 = arith.constant 2 : index
      %48 = arith.index_cast %47 : i32 to index
      %c0_45 = arith.constant 0 : index
      %49 = vector.load %arg1[%c0_43, %c2_44, %48, %c0_45] : memref<1x4x16x16xf32, #tpu.memory_space<vmem>>, vector<1x1x1x4xf32>
      %50 = vector.shape_cast %49 : vector<1x1x1x4xf32> to vector<1x4xf32>
      %c4_i32_46 = arith.constant 4 : i32
      %51 = arith.muli %arg3, %c4_i32_46 : i32
      %c2_i32_47 = arith.constant 2 : i32
      %52 = arith.addi %51, %c2_i32_47 : i32
      %c0_48 = arith.constant 0 : index
      %c2_49 = arith.constant 2 : index
      %53 = arith.index_cast %52 : i32 to index
      %c0_50 = arith.constant 0 : index
      %54 = vector.load %arg1[%c0_48, %c2_49, %53, %c0_50] : memref<1x4x16x16xf32, #tpu.memory_space<vmem>>, vector<1x1x1x4xf32>
      %55 = vector.shape_cast %54 : vector<1x1x1x4xf32> to vector<1x4xf32>
      %c4_i32_51 = arith.constant 4 : i32
      %56 = arith.muli %arg3, %c4_i32_51 : i32
      %c3_i32_52 = arith.constant 3 : i32
      %57 = arith.addi %56, %c3_i32_52 : i32
      %c0_53 = arith.constant 0 : index
      %c2_54 = arith.constant 2 : index
      %58 = arith.index_cast %57 : i32 to index
      %c0_55 = arith.constant 0 : index
      %59 = vector.load %arg1[%c0_53, %c2_54, %58, %c0_55] : memref<1x4x16x16xf32, #tpu.memory_space<vmem>>, vector<1x1x1x4xf32>
      %60 = vector.shape_cast %59 : vector<1x1x1x4xf32> to vector<1x4xf32>
      %c4_i32_56 = arith.constant 4 : i32
      %61 = arith.muli %arg3, %c4_i32_56 : i32
      %c0_i32_57 = arith.constant 0 : i32
      %62 = arith.addi %61, %c0_i32_57 : i32
      %c0_58 = arith.constant 0 : index
      %c3 = arith.constant 3 : index
      %63 = arith.index_cast %62 : i32 to index
      %c0_59 = arith.constant 0 : index
      %64 = vector.load %arg1[%c0_58, %c3, %63, %c0_59] : memref<1x4x16x16xf32, #tpu.memory_space<vmem>>, vector<1x1x1x4xf32>
      %65 = vector.shape_cast %64 : vector<1x1x1x4xf32> to vector<1x4xf32>
      %c4_i32_60 = arith.constant 4 : i32
      %66 = arith.muli %arg3, %c4_i32_60 : i32
      %c1_i32_61 = arith.constant 1 : i32
      %67 = arith.addi %66, %c1_i32_61 : i32
      %c0_62 = arith.constant 0 : index
      %c3_63 = arith.constant 3 : index
      %68 = arith.index_cast %67 : i32 to index
      %c0_64 = arith.constant 0 : index
      %69 = vector.load %arg1[%c0_62, %c3_63, %68, %c0_64] : memref<1x4x16x16xf32, #tpu.memory_space<vmem>>, vector<1x1x1x4xf32>
      %70 = vector.shape_cast %69 : vector<1x1x1x4xf32> to vector<1x4xf32>
      %c4_i32_65 = arith.constant 4 : i32
      %71 = arith.muli %arg3, %c4_i32_65 : i32
      %c2_i32_66 = arith.constant 2 : i32
      %72 = arith.addi %71, %c2_i32_66 : i32
      %c0_67 = arith.constant 0 : index
      %c3_68 = arith.constant 3 : index
      %73 = arith.index_cast %72 : i32 to index
      %c0_69 = arith.constant 0 : index
      %74 = vector.load %arg1[%c0_67, %c3_68, %73, %c0_69] : memref<1x4x16x16xf32, #tpu.memory_space<vmem>>, vector<1x1x1x4xf32>
      %75 = vector.shape_cast %74 : vector<1x1x1x4xf32> to vector<1x4xf32>
      %c4_i32_70 = arith.constant 4 : i32
      %76 = arith.muli %arg3, %c4_i32_70 : i32
      %c3_i32_71 = arith.constant 3 : i32
      %77 = arith.addi %76, %c3_i32_71 : i32
      %c0_72 = arith.constant 0 : index
      %c3_73 = arith.constant 3 : index
      %78 = arith.index_cast %77 : i32 to index
      %c0_74 = arith.constant 0 : index
      %79 = vector.load %arg1[%c0_72, %c3_73, %78, %c0_74] : memref<1x4x16x16xf32, #tpu.memory_space<vmem>>, vector<1x1x1x4xf32>
      %80 = vector.shape_cast %79 : vector<1x1x1x4xf32> to vector<1x4xf32>
      %81 = tpu.concatenate %5, %10, %15, %20, %25, %30, %35, %40, %45, %50, %55, %60, %65, %70, %75, %80 in 1 : vector<1x4xf32>, vector<1x4xf32>, vector<1x4xf32>, vector<1x4xf32>, vector<1x4xf32>, vector<1x4xf32>, vector<1x4xf32>, vector<1x4xf32>, vector<1x4xf32>, vector<1x4xf32>, vector<1x4xf32>, vector<1x4xf32>, vector<1x4xf32>, vector<1x4xf32>, vector<1x4xf32>, vector<1x4xf32> -> vector<1x64xf32>
      %c4_i32_75 = arith.constant 4 : i32
      %82 = arith.muli %arg3, %c4_i32_75 : i32
      %c0_i32_76 = arith.constant 0 : i32
      %83 = arith.addi %82, %c0_i32_76 : i32
      %c0_77 = arith.constant 0 : index
      %84 = arith.index_cast %83 : i32 to index
      %c0_78 = arith.constant 0 : index
      %85 = vector.load %arg2[%c0_77, %84, %c0_78] : memref<1x16x64xf32, #tpu.memory_space<vmem>>, vector<1x1x64xf32>
      %86 = vector.shape_cast %85 : vector<1x1x64xf32> to vector<1x64xf32>
      %87 = vector.shape_cast %81 : vector<1x64xf32> to vector<1x1x64xf32>
      tpu.vector_store %arg2[%c0_77, %84, %c0_78], %87 {strides = array<i32>} : memref<1x16x64xf32, #tpu.memory_space<vmem>>, vector<1x1x64xf32>,
      %c4_i32_79 = arith.constant 4 : i32
      %88 = arith.muli %arg3, %c4_i32_79 : i32
      %c0_i32_80 = arith.constant 0 : i32
      %89 = arith.addi %88, %c0_i32_80 : i32
      %c0_81 = arith.constant 0 : index
      %c0_82 = arith.constant 0 : index
      %90 = arith.index_cast %89 : i32 to index
      %c4 = arith.constant 4 : index
      %91 = vector.load %arg1[%c0_81, %c0_82, %90, %c4] : memref<1x4x16x16xf32, #tpu.memory_space<vmem>>, vector<1x1x1x4xf32>
      %92 = vector.shape_cast %91 : vector<1x1x1x4xf32> to vector<1x4xf32>
      %c4_i32_83 = arith.constant 4 : i32
      %93 = arith.muli %arg3, %c4_i32_83 : i32
      %c1_i32_84 = arith.constant 1 : i32
      %94 = arith.addi %93, %c1_i32_84 : i32
      %c0_85 = arith.constant 0 : index
      %c0_86 = arith.constant 0 : index
      %95 = arith.index_cast %94 : i32 to index
      %c4_87 = arith.constant 4 : index
      %96 = vector.load %arg1[%c0_85, %c0_86, %95, %c4_87] : memref<1x4x16x16xf32, #tpu.memory_space<vmem>>, vector<1x1x1x4xf32>
      %97 = vector.shape_cast %96 : vector<1x1x1x4xf32> to vector<1x4xf32>
      %c4_i32_88 = arith.constant 4 : i32
      %98 = arith.muli %arg3, %c4_i32_88 : i32
      %c2_i32_89 = arith.constant 2 : i32
      %99 = arith.addi %98, %c2_i32_89 : i32
      %c0_90 = arith.constant 0 : index
      %c0_91 = arith.constant 0 : index
      %100 = arith.index_cast %99 : i32 to index
      %c4_92 = arith.constant 4 : index
      %101 = vector.load %arg1[%c0_90, %c0_91, %100, %c4_92] : memref<1x4x16x16xf32, #tpu.memory_space<vmem>>, vector<1x1x1x4xf32>
      %102 = vector.shape_cast %101 : vector<1x1x1x4xf32> to vector<1x4xf32>
      %c4_i32_93 = arith.constant 4 : i32
      %103 = arith.muli %arg3, %c4_i32_93 : i32
      %c3_i32_94 = arith.constant 3 : i32
      %104 = arith.addi %103, %c3_i32_94 : i32
      %c0_95 = arith.constant 0 : index
      %c0_96 = arith.constant 0 : index
      %105 = arith.index_cast %104 : i32 to index
      %c4_97 = arith.constant 4 : index
      %106 = vector.load %arg1[%c0_95, %c0_96, %105, %c4_97] : memref<1x4x16x16xf32, #tpu.memory_space<vmem>>, vector<1x1x1x4xf32>
      %107 = vector.shape_cast %106 : vector<1x1x1x4xf32> to vector<1x4xf32>
      %c4_i32_98 = arith.constant 4 : i32
      %108 = arith.muli %arg3, %c4_i32_98 : i32
      %c0_i32_99 = arith.constant 0 : i32
      %109 = arith.addi %108, %c0_i32_99 : i32
      %c0_100 = arith.constant 0 : index
      %c1_101 = arith.constant 1 : index
      %110 = arith.index_cast %109 : i32 to index
      %c4_102 = arith.constant 4 : index
      %111 = vector.load %arg1[%c0_100, %c1_101, %110, %c4_102] : memref<1x4x16x16xf32, #tpu.memory_space<vmem>>, vector<1x1x1x4xf32>
      %112 = vector.shape_cast %111 : vector<1x1x1x4xf32> to vector<1x4xf32>
      %c4_i32_103 = arith.constant 4 : i32
      %113 = arith.muli %arg3, %c4_i32_103 : i32
      %c1_i32_104 = arith.constant 1 : i32
      %114 = arith.addi %113, %c1_i32_104 : i32
      %c0_105 = arith.constant 0 : index
      %c1_106 = arith.constant 1 : index
      %115 = arith.index_cast %114 : i32 to index
      %c4_107 = arith.constant 4 : index
      %116 = vector.load %arg1[%c0_105, %c1_106, %115, %c4_107] : memref<1x4x16x16xf32, #tpu.memory_space<vmem>>, vector<1x1x1x4xf32>
      %117 = vector.shape_cast %116 : vector<1x1x1x4xf32> to vector<1x4xf32>
      %c4_i32_108 = arith.constant 4 : i32
      %118 = arith.muli %arg3, %c4_i32_108 : i32
      %c2_i32_109 = arith.constant 2 : i32
      %119 = arith.addi %118, %c2_i32_109 : i32
      %c0_110 = arith.constant 0 : index
      %c1_111 = arith.constant 1 : index
      %120 = arith.index_cast %119 : i32 to index
      %c4_112 = arith.constant 4 : index
      %121 = vector.load %arg1[%c0_110, %c1_111, %120, %c4_112] : memref<1x4x16x16xf32, #tpu.memory_space<vmem>>, vector<1x1x1x4xf32>
      %122 = vector.shape_cast %121 : vector<1x1x1x4xf32> to vector<1x4xf32>
      %c4_i32_113 = arith.constant 4 : i32
      %123 = arith.muli %arg3, %c4_i32_113 : i32
      %c3_i32_114 = arith.constant 3 : i32
      %124 = arith.addi %123, %c3_i32_114 : i32
      %c0_115 = arith.constant 0 : index
      %c1_116 = arith.constant 1 : index
      %125 = arith.index_cast %124 : i32 to index
      %c4_117 = arith.constant 4 : index
      %126 = vector.load %arg1[%c0_115, %c1_116, %125, %c4_117] : memref<1x4x16x16xf32, #tpu.memory_space<vmem>>, vector<1x1x1x4xf32>
      %127 = vector.shape_cast %126 : vector<1x1x1x4xf32> to vector<1x4xf32>
      %c4_i32_118 = arith.constant 4 : i32
      %128 = arith.muli %arg3, %c4_i32_118 : i32
      %c0_i32_119 = arith.constant 0 : i32
      %129 = arith.addi %128, %c0_i32_119 : i32
      %c0_120 = arith.constant 0 : index
      %c2_121 = arith.constant 2 : index
      %130 = arith.index_cast %129 : i32 to index
      %c4_122 = arith.constant 4 : index
      %131 = vector.load %arg1[%c0_120, %c2_121, %130, %c4_122] : memref<1x4x16x16xf32, #tpu.memory_space<vmem>>, vector<1x1x1x4xf32>
      %132 = vector.shape_cast %131 : vector<1x1x1x4xf32> to vector<1x4xf32>
      %c4_i32_123 = arith.constant 4 : i32
      %133 = arith.muli %arg3, %c4_i32_123 : i32
      %c1_i32_124 = arith.constant 1 : i32
      %134 = arith.addi %133, %c1_i32_124 : i32
      %c0_125 = arith.constant 0 : index
      %c2_126 = arith.constant 2 : index
      %135 = arith.index_cast %134 : i32 to index
      %c4_127 = arith.constant 4 : index
      %136 = vector.load %arg1[%c0_125, %c2_126, %135, %c4_127] : memref<1x4x16x16xf32, #tpu.memory_space<vmem>>, vector<1x1x1x4xf32>
      %137 = vector.shape_cast %136 : vector<1x1x1x4xf32> to vector<1x4xf32>
      %c4_i32_128 = arith.constant 4 : i32
      %138 = arith.muli %arg3, %c4_i32_128 : i32
      %c2_i32_129 = arith.constant 2 : i32
      %139 = arith.addi %138, %c2_i32_129 : i32
      %c0_130 = arith.constant 0 : index
      %c2_131 = arith.constant 2 : index
      %140 = arith.index_cast %139 : i32 to index
      %c4_132 = arith.constant 4 : index
      %141 = vector.load %arg1[%c0_130, %c2_131, %140, %c4_132] : memref<1x4x16x16xf32, #tpu.memory_space<vmem>>, vector<1x1x1x4xf32>
      %142 = vector.shape_cast %141 : vector<1x1x1x4xf32> to vector<1x4xf32>
      %c4_i32_133 = arith.constant 4 : i32
      %143 = arith.muli %arg3, %c4_i32_133 : i32
      %c3_i32_134 = arith.constant 3 : i32
      %144 = arith.addi %143, %c3_i32_134 : i32
      %c0_135 = arith.constant 0 : index
      %c2_136 = arith.constant 2 : index
      %145 = arith.index_cast %144 : i32 to index
      %c4_137 = arith.constant 4 : index
      %146 = vector.load %arg1[%c0_135, %c2_136, %145, %c4_137] : memref<1x4x16x16xf32, #tpu.memory_space<vmem>>, vector<1x1x1x4xf32>
      %147 = vector.shape_cast %146 : vector<1x1x1x4xf32> to vector<1x4xf32>
      %c4_i32_138 = arith.constant 4 : i32
      %148 = arith.muli %arg3, %c4_i32_138 : i32
      %c0_i32_139 = arith.constant 0 : i32
      %149 = arith.addi %148, %c0_i32_139 : i32
      %c0_140 = arith.constant 0 : index
      %c3_141 = arith.constant 3 : index
      %150 = arith.index_cast %149 : i32 to index
      %c4_142 = arith.constant 4 : index
      %151 = vector.load %arg1[%c0_140, %c3_141, %150, %c4_142] : memref<1x4x16x16xf32, #tpu.memory_space<vmem>>, vector<1x1x1x4xf32>
      %152 = vector.shape_cast %151 : vector<1x1x1x4xf32> to vector<1x4xf32>
      %c4_i32_143 = arith.constant 4 : i32
      %153 = arith.muli %arg3, %c4_i32_143 : i32
      %c1_i32_144 = arith.constant 1 : i32
      %154 = arith.addi %153, %c1_i32_144 : i32
      %c0_145 = arith.constant 0 : index
      %c3_146 = arith.constant 3 : index
      %155 = arith.index_cast %154 : i32 to index
      %c4_147 = arith.constant 4 : index
      %156 = vector.load %arg1[%c0_145, %c3_146, %155, %c4_147] : memref<1x4x16x16xf32, #tpu.memory_space<vmem>>, vector<1x1x1x4xf32>
      %157 = vector.shape_cast %156 : vector<1x1x1x4xf32> to vector<1x4xf32>
      %c4_i32_148 = arith.constant 4 : i32
      %158 = arith.muli %arg3, %c4_i32_148 : i32
      %c2_i32_149 = arith.constant 2 : i32
      %159 = arith.addi %158, %c2_i32_149 : i32
      %c0_150 = arith.constant 0 : index
      %c3_151 = arith.constant 3 : index
      %160 = arith.index_cast %159 : i32 to index
      %c4_152 = arith.constant 4 : index
      %161 = vector.load %arg1[%c0_150, %c3_151, %160, %c4_152] : memref<1x4x16x16xf32, #tpu.memory_space<vmem>>, vector<1x1x1x4xf32>
      %162 = vector.shape_cast %161 : vector<1x1x1x4xf32> to vector<1x4xf32>
      %c4_i32_153 = arith.constant 4 : i32
      %163 = arith.muli %arg3, %c4_i32_153 : i32
      %c3_i32_154 = arith.constant 3 : i32
      %164 = arith.addi %163, %c3_i32_154 : i32
      %c0_155 = arith.constant 0 : index
      %c3_156 = arith.constant 3 : index
      %165 = arith.index_cast %164 : i32 to index
      %c4_157 = arith.constant 4 : index
      %166 = vector.load %arg1[%c0_155, %c3_156, %165, %c4_157] : memref<1x4x16x16xf32, #tpu.memory_space<vmem>>, vector<1x1x1x4xf32>
      %167 = vector.shape_cast %166 : vector<1x1x1x4xf32> to vector<1x4xf32>
      %168 = tpu.concatenate %92, %97, %102, %107, %112, %117, %122, %127, %132, %137, %142, %147, %152, %157, %162, %167 in 1 : vector<1x4xf32>, vector<1x4xf32>, vector<1x4xf32>, vector<1x4xf32>, vector<1x4xf32>, vector<1x4xf32>, vector<1x4xf32>, vector<1x4xf32>, vector<1x4xf32>, vector<1x4xf32>, vector<1x4xf32>, vector<1x4xf32>, vector<1x4xf32>, vector<1x4xf32>, vector<1x4xf32>, vector<1x4xf32> -> vector<1x64xf32>
      %c4_i32_158 = arith.constant 4 : i32
      %169 = arith.muli %arg3, %c4_i32_158 : i32
      %c1_i32_159 = arith.constant 1 : i32
      %170 = arith.addi %169, %c1_i32_159 : i32
      %c0_160 = arith.constant 0 : index
      %171 = arith.index_cast %170 : i32 to index
      %c0_161 = arith.constant 0 : index
      %172 = vector.load %arg2[%c0_160, %171, %c0_161] : memref<1x16x64xf32, #tpu.memory_space<vmem>>, vector<1x1x64xf32>
      %173 = vector.shape_cast %172 : vector<1x1x64xf32> to vector<1x64xf32>
      %174 = vector.shape_cast %168 : vector<1x64xf32> to vector<1x1x64xf32>
      tpu.vector_store %arg2[%c0_160, %171, %c0_161], %174 {strides = array<i32>} : memref<1x16x64xf32, #tpu.memory_space<vmem>>, vector<1x1x64xf32>,
      %c4_i32_162 = arith.constant 4 : i32
      %175 = arith.muli %arg3, %c4_i32_162 : i32
      %c0_i32_163 = arith.constant 0 : i32
      %176 = arith.addi %175, %c0_i32_163 : i32
      %c0_164 = arith.constant 0 : index
      %c0_165 = arith.constant 0 : index
      %177 = arith.index_cast %176 : i32 to index
      %c8 = arith.constant 8 : index
      %178 = vector.load %arg1[%c0_164, %c0_165, %177, %c8] : memref<1x4x16x16xf32, #tpu.memory_space<vmem>>, vector<1x1x1x4xf32>
      %179 = vector.shape_cast %178 : vector<1x1x1x4xf32> to vector<1x4xf32>
      %c4_i32_166 = arith.constant 4 : i32
      %180 = arith.muli %arg3, %c4_i32_166 : i32
      %c1_i32_167 = arith.constant 1 : i32
      %181 = arith.addi %180, %c1_i32_167 : i32
      %c0_168 = arith.constant 0 : index
      %c0_169 = arith.constant 0 : index
      %182 = arith.index_cast %181 : i32 to index
      %c8_170 = arith.constant 8 : index
      %183 = vector.load %arg1[%c0_168, %c0_169, %182, %c8_170] : memref<1x4x16x16xf32, #tpu.memory_space<vmem>>, vector<1x1x1x4xf32>
      %184 = vector.shape_cast %183 : vector<1x1x1x4xf32> to vector<1x4xf32>
      %c4_i32_171 = arith.constant 4 : i32
      %185 = arith.muli %arg3, %c4_i32_171 : i32
      %c2_i32_172 = arith.constant 2 : i32
      %186 = arith.addi %185, %c2_i32_172 : i32
      %c0_173 = arith.constant 0 : index
      %c0_174 = arith.constant 0 : index
      %187 = arith.index_cast %186 : i32 to index
      %c8_175 = arith.constant 8 : index
      %188 = vector.load %arg1[%c0_173, %c0_174, %187, %c8_175] : memref<1x4x16x16xf32, #tpu.memory_space<vmem>>, vector<1x1x1x4xf32>
      %189 = vector.shape_cast %188 : vector<1x1x1x4xf32> to vector<1x4xf32>
      %c4_i32_176 = arith.constant 4 : i32
      %190 = arith.muli %arg3, %c4_i32_176 : i32
      %c3_i32_177 = arith.constant 3 : i32
      %191 = arith.addi %190, %c3_i32_177 : i32
      %c0_178 = arith.constant 0 : index
      %c0_179 = arith.constant 0 : index
      %192 = arith.index_cast %191 : i32 to index
      %c8_180 = arith.constant 8 : index
      %193 = vector.load %arg1[%c0_178, %c0_179, %192, %c8_180] : memref<1x4x16x16xf32, #tpu.memory_space<vmem>>, vector<1x1x1x4xf32>
      %194 = vector.shape_cast %193 : vector<1x1x1x4xf32> to vector<1x4xf32>
      %c4_i32_181 = arith.constant 4 : i32
      %195 = arith.muli %arg3, %c4_i32_181 : i32
      %c0_i32_182 = arith.constant 0 : i32
      %196 = arith.addi %195, %c0_i32_182 : i32
      %c0_183 = arith.constant 0 : index
      %c1_184 = arith.constant 1 : index
      %197 = arith.index_cast %196 : i32 to index
      %c8_185 = arith.constant 8 : index
      %198 = vector.load %arg1[%c0_183, %c1_184, %197, %c8_185] : memref<1x4x16x16xf32, #tpu.memory_space<vmem>>, vector<1x1x1x4xf32>
      %199 = vector.shape_cast %198 : vector<1x1x1x4xf32> to vector<1x4xf32>
      %c4_i32_186 = arith.constant 4 : i32
      %200 = arith.muli %arg3, %c4_i32_186 : i32
      %c1_i32_187 = arith.constant 1 : i32
      %201 = arith.addi %200, %c1_i32_187 : i32
      %c0_188 = arith.constant 0 : index
      %c1_189 = arith.constant 1 : index
      %202 = arith.index_cast %201 : i32 to index
      %c8_190 = arith.constant 8 : index
      %203 = vector.load %arg1[%c0_188, %c1_189, %202, %c8_190] : memref<1x4x16x16xf32, #tpu.memory_space<vmem>>, vector<1x1x1x4xf32>
      %204 = vector.shape_cast %203 : vector<1x1x1x4xf32> to vector<1x4xf32>
      %c4_i32_191 = arith.constant 4 : i32
      %205 = arith.muli %arg3, %c4_i32_191 : i32
      %c2_i32_192 = arith.constant 2 : i32
      %206 = arith.addi %205, %c2_i32_192 : i32
      %c0_193 = arith.constant 0 : index
      %c1_194 = arith.constant 1 : index
      %207 = arith.index_cast %206 : i32 to index
      %c8_195 = arith.constant 8 : index
      %208 = vector.load %arg1[%c0_193, %c1_194, %207, %c8_195] : memref<1x4x16x16xf32, #tpu.memory_space<vmem>>, vector<1x1x1x4xf32>
      %209 = vector.shape_cast %208 : vector<1x1x1x4xf32> to vector<1x4xf32>
      %c4_i32_196 = arith.constant 4 : i32
      %210 = arith.muli %arg3, %c4_i32_196 : i32
      %c3_i32_197 = arith.constant 3 : i32
      %211 = arith.addi %210, %c3_i32_197 : i32
      %c0_198 = arith.constant 0 : index
      %c1_199 = arith.constant 1 : index
      %212 = arith.index_cast %211 : i32 to index
      %c8_200 = arith.constant 8 : index
      %213 = vector.load %arg1[%c0_198, %c1_199, %212, %c8_200] : memref<1x4x16x16xf32, #tpu.memory_space<vmem>>, vector<1x1x1x4xf32>
      %214 = vector.shape_cast %213 : vector<1x1x1x4xf32> to vector<1x4xf32>
      %c4_i32_201 = arith.constant 4 : i32
      %215 = arith.muli %arg3, %c4_i32_201 : i32
      %c0_i32_202 = arith.constant 0 : i32
      %216 = arith.addi %215, %c0_i32_202 : i32
      %c0_203 = arith.constant 0 : index
      %c2_204 = arith.constant 2 : index
      %217 = arith.index_cast %216 : i32 to index
      %c8_205 = arith.constant 8 : index
      %218 = vector.load %arg1[%c0_203, %c2_204, %217, %c8_205] : memref<1x4x16x16xf32, #tpu.memory_space<vmem>>, vector<1x1x1x4xf32>
      %219 = vector.shape_cast %218 : vector<1x1x1x4xf32> to vector<1x4xf32>
      %c4_i32_206 = arith.constant 4 : i32
      %220 = arith.muli %arg3, %c4_i32_206 : i32
      %c1_i32_207 = arith.constant 1 : i32
      %221 = arith.addi %220, %c1_i32_207 : i32
      %c0_208 = arith.constant 0 : index
      %c2_209 = arith.constant 2 : index
      %222 = arith.index_cast %221 : i32 to index
      %c8_210 = arith.constant 8 : index
      %223 = vector.load %arg1[%c0_208, %c2_209, %222, %c8_210] : memref<1x4x16x16xf32, #tpu.memory_space<vmem>>, vector<1x1x1x4xf32>
      %224 = vector.shape_cast %223 : vector<1x1x1x4xf32> to vector<1x4xf32>
      %c4_i32_211 = arith.constant 4 : i32
      %225 = arith.muli %arg3, %c4_i32_211 : i32
      %c2_i32_212 = arith.constant 2 : i32
      %226 = arith.addi %225, %c2_i32_212 : i32
      %c0_213 = arith.constant 0 : index
      %c2_214 = arith.constant 2 : index
      %227 = arith.index_cast %226 : i32 to index
      %c8_215 = arith.constant 8 : index
      %228 = vector.load %arg1[%c0_213, %c2_214, %227, %c8_215] : memref<1x4x16x16xf32, #tpu.memory_space<vmem>>, vector<1x1x1x4xf32>
      %229 = vector.shape_cast %228 : vector<1x1x1x4xf32> to vector<1x4xf32>
      %c4_i32_216 = arith.constant 4 : i32
      %230 = arith.muli %arg3, %c4_i32_216 : i32
      %c3_i32_217 = arith.constant 3 : i32
      %231 = arith.addi %230, %c3_i32_217 : i32
      %c0_218 = arith.constant 0 : index
      %c2_219 = arith.constant 2 : index
      %232 = arith.index_cast %231 : i32 to index
      %c8_220 = arith.constant 8 : index
      %233 = vector.load %arg1[%c0_218, %c2_219, %232, %c8_220] : memref<1x4x16x16xf32, #tpu.memory_space<vmem>>, vector<1x1x1x4xf32>
      %234 = vector.shape_cast %233 : vector<1x1x1x4xf32> to vector<1x4xf32>
      %c4_i32_221 = arith.constant 4 : i32
      %235 = arith.muli %arg3, %c4_i32_221 : i32
      %c0_i32_222 = arith.constant 0 : i32
      %236 = arith.addi %235, %c0_i32_222 : i32
      %c0_223 = arith.constant 0 : index
      %c3_224 = arith.constant 3 : index
      %237 = arith.index_cast %236 : i32 to index
      %c8_225 = arith.constant 8 : index
      %238 = vector.load %arg1[%c0_223, %c3_224, %237, %c8_225] : memref<1x4x16x16xf32, #tpu.memory_space<vmem>>, vector<1x1x1x4xf32>
      %239 = vector.shape_cast %238 : vector<1x1x1x4xf32> to vector<1x4xf32>
      %c4_i32_226 = arith.constant 4 : i32
      %240 = arith.muli %arg3, %c4_i32_226 : i32
      %c1_i32_227 = arith.constant 1 : i32
      %241 = arith.addi %240, %c1_i32_227 : i32
      %c0_228 = arith.constant 0 : index
      %c3_229 = arith.constant 3 : index
      %242 = arith.index_cast %241 : i32 to index
      %c8_230 = arith.constant 8 : index
      %243 = vector.load %arg1[%c0_228, %c3_229, %242, %c8_230] : memref<1x4x16x16xf32, #tpu.memory_space<vmem>>, vector<1x1x1x4xf32>
      %244 = vector.shape_cast %243 : vector<1x1x1x4xf32> to vector<1x4xf32>
      %c4_i32_231 = arith.constant 4 : i32
      %245 = arith.muli %arg3, %c4_i32_231 : i32
      %c2_i32_232 = arith.constant 2 : i32
      %246 = arith.addi %245, %c2_i32_232 : i32
      %c0_233 = arith.constant 0 : index
      %c3_234 = arith.constant 3 : index
      %247 = arith.index_cast %246 : i32 to index
      %c8_235 = arith.constant 8 : index
      %248 = vector.load %arg1[%c0_233, %c3_234, %247, %c8_235] : memref<1x4x16x16xf32, #tpu.memory_space<vmem>>, vector<1x1x1x4xf32>
      %249 = vector.shape_cast %248 : vector<1x1x1x4xf32> to vector<1x4xf32>
      %c4_i32_236 = arith.constant 4 : i32
      %250 = arith.muli %arg3, %c4_i32_236 : i32
      %c3_i32_237 = arith.constant 3 : i32
      %251 = arith.addi %250, %c3_i32_237 : i32
      %c0_238 = arith.constant 0 : index
      %c3_239 = arith.constant 3 : index
      %252 = arith.index_cast %251 : i32 to index
      %c8_240 = arith.constant 8 : index
      %253 = vector.load %arg1[%c0_238, %c3_239, %252, %c8_240] : memref<1x4x16x16xf32, #tpu.memory_space<vmem>>, vector<1x1x1x4xf32>
      %254 = vector.shape_cast %253 : vector<1x1x1x4xf32> to vector<1x4xf32>
      %255 = tpu.concatenate %179, %184, %189, %194, %199, %204, %209, %214, %219, %224, %229, %234, %239, %244, %249, %254 in 1 : vector<1x4xf32>, vector<1x4xf32>, vector<1x4xf32>, vector<1x4xf32>, vector<1x4xf32>, vector<1x4xf32>, vector<1x4xf32>, vector<1x4xf32>, vector<1x4xf32>, vector<1x4xf32>, vector<1x4xf32>, vector<1x4xf32>, vector<1x4xf32>, vector<1x4xf32>, vector<1x4xf32>, vector<1x4xf32> -> vector<1x64xf32>
      %c4_i32_241 = arith.constant 4 : i32
      %256 = arith.muli %arg3, %c4_i32_241 : i32
      %c2_i32_242 = arith.constant 2 : i32
      %257 = arith.addi %256, %c2_i32_242 : i32
      %c0_243 = arith.constant 0 : index
      %258 = arith.index_cast %257 : i32 to index
      %c0_244 = arith.constant 0 : index
      %259 = vector.load %arg2[%c0_243, %258, %c0_244] : memref<1x16x64xf32, #tpu.memory_space<vmem>>, vector<1x1x64xf32>
      %260 = vector.shape_cast %259 : vector<1x1x64xf32> to vector<1x64xf32>
      %261 = vector.shape_cast %255 : vector<1x64xf32> to vector<1x1x64xf32>
      tpu.vector_store %arg2[%c0_243, %258, %c0_244], %261 {strides = array<i32>} : memref<1x16x64xf32, #tpu.memory_space<vmem>>, vector<1x1x64xf32>,
      %c4_i32_245 = arith.constant 4 : i32
      %262 = arith.muli %arg3, %c4_i32_245 : i32
      %c0_i32_246 = arith.constant 0 : i32
      %263 = arith.addi %262, %c0_i32_246 : i32
      %c0_247 = arith.constant 0 : index
      %c0_248 = arith.constant 0 : index
      %264 = arith.index_cast %263 : i32 to index
      %c12 = arith.constant 12 : index
      %265 = vector.load %arg1[%c0_247, %c0_248, %264, %c12] : memref<1x4x16x16xf32, #tpu.memory_space<vmem>>, vector<1x1x1x4xf32>
      %266 = vector.shape_cast %265 : vector<1x1x1x4xf32> to vector<1x4xf32>
      %c4_i32_249 = arith.constant 4 : i32
      %267 = arith.muli %arg3, %c4_i32_249 : i32
      %c1_i32_250 = arith.constant 1 : i32
      %268 = arith.addi %267, %c1_i32_250 : i32
      %c0_251 = arith.constant 0 : index
      %c0_252 = arith.constant 0 : index
      %269 = arith.index_cast %268 : i32 to index
      %c12_253 = arith.constant 12 : index
      %270 = vector.load %arg1[%c0_251, %c0_252, %269, %c12_253] : memref<1x4x16x16xf32, #tpu.memory_space<vmem>>, vector<1x1x1x4xf32>
      %271 = vector.shape_cast %270 : vector<1x1x1x4xf32> to vector<1x4xf32>
      %c4_i32_254 = arith.constant 4 : i32
      %272 = arith.muli %arg3, %c4_i32_254 : i32
      %c2_i32_255 = arith.constant 2 : i32
      %273 = arith.addi %272, %c2_i32_255 : i32
      %c0_256 = arith.constant 0 : index
      %c0_257 = arith.constant 0 : index
      %274 = arith.index_cast %273 : i32 to index
      %c12_258 = arith.constant 12 : index
      %275 = vector.load %arg1[%c0_256, %c0_257, %274, %c12_258] : memref<1x4x16x16xf32, #tpu.memory_space<vmem>>, vector<1x1x1x4xf32>
      %276 = vector.shape_cast %275 : vector<1x1x1x4xf32> to vector<1x4xf32>
      %c4_i32_259 = arith.constant 4 : i32
      %277 = arith.muli %arg3, %c4_i32_259 : i32
      %c3_i32_260 = arith.constant 3 : i32
      %278 = arith.addi %277, %c3_i32_260 : i32
      %c0_261 = arith.constant 0 : index
      %c0_262 = arith.constant 0 : index
      %279 = arith.index_cast %278 : i32 to index
      %c12_263 = arith.constant 12 : index
      %280 = vector.load %arg1[%c0_261, %c0_262, %279, %c12_263] : memref<1x4x16x16xf32, #tpu.memory_space<vmem>>, vector<1x1x1x4xf32>
      %281 = vector.shape_cast %280 : vector<1x1x1x4xf32> to vector<1x4xf32>
      %c4_i32_264 = arith.constant 4 : i32
      %282 = arith.muli %arg3, %c4_i32_264 : i32
      %c0_i32_265 = arith.constant 0 : i32
      %283 = arith.addi %282, %c0_i32_265 : i32
      %c0_266 = arith.constant 0 : index
      %c1_267 = arith.constant 1 : index
      %284 = arith.index_cast %283 : i32 to index
      %c12_268 = arith.constant 12 : index
      %285 = vector.load %arg1[%c0_266, %c1_267, %284, %c12_268] : memref<1x4x16x16xf32, #tpu.memory_space<vmem>>, vector<1x1x1x4xf32>
      %286 = vector.shape_cast %285 : vector<1x1x1x4xf32> to vector<1x4xf32>
      %c4_i32_269 = arith.constant 4 : i32
      %287 = arith.muli %arg3, %c4_i32_269 : i32
      %c1_i32_270 = arith.constant 1 : i32
      %288 = arith.addi %287, %c1_i32_270 : i32
      %c0_271 = arith.constant 0 : index
      %c1_272 = arith.constant 1 : index
      %289 = arith.index_cast %288 : i32 to index
      %c12_273 = arith.constant 12 : index
      %290 = vector.load %arg1[%c0_271, %c1_272, %289, %c12_273] : memref<1x4x16x16xf32, #tpu.memory_space<vmem>>, vector<1x1x1x4xf32>
      %291 = vector.shape_cast %290 : vector<1x1x1x4xf32> to vector<1x4xf32>
      %c4_i32_274 = arith.constant 4 : i32
      %292 = arith.muli %arg3, %c4_i32_274 : i32
      %c2_i32_275 = arith.constant 2 : i32
      %293 = arith.addi %292, %c2_i32_275 : i32
      %c0_276 = arith.constant 0 : index
      %c1_277 = arith.constant 1 : index
      %294 = arith.index_cast %293 : i32 to index
      %c12_278 = arith.constant 12 : index
      %295 = vector.load %arg1[%c0_276, %c1_277, %294, %c12_278] : memref<1x4x16x16xf32, #tpu.memory_space<vmem>>, vector<1x1x1x4xf32>
      %296 = vector.shape_cast %295 : vector<1x1x1x4xf32> to vector<1x4xf32>
      %c4_i32_279 = arith.constant 4 : i32
      %297 = arith.muli %arg3, %c4_i32_279 : i32
      %c3_i32_280 = arith.constant 3 : i32
      %298 = arith.addi %297, %c3_i32_280 : i32
      %c0_281 = arith.constant 0 : index
      %c1_282 = arith.constant 1 : index
      %299 = arith.index_cast %298 : i32 to index
      %c12_283 = arith.constant 12 : index
      %300 = vector.load %arg1[%c0_281, %c1_282, %299, %c12_283] : memref<1x4x16x16xf32, #tpu.memory_space<vmem>>, vector<1x1x1x4xf32>
      %301 = vector.shape_cast %300 : vector<1x1x1x4xf32> to vector<1x4xf32>
      %c4_i32_284 = arith.constant 4 : i32
      %302 = arith.muli %arg3, %c4_i32_284 : i32
      %c0_i32_285 = arith.constant 0 : i32
      %303 = arith.addi %302, %c0_i32_285 : i32
      %c0_286 = arith.constant 0 : index
      %c2_287 = arith.constant 2 : index
      %304 = arith.index_cast %303 : i32 to index
      %c12_288 = arith.constant 12 : index
      %305 = vector.load %arg1[%c0_286, %c2_287, %304, %c12_288] : memref<1x4x16x16xf32, #tpu.memory_space<vmem>>, vector<1x1x1x4xf32>
      %306 = vector.shape_cast %305 : vector<1x1x1x4xf32> to vector<1x4xf32>
      %c4_i32_289 = arith.constant 4 : i32
      %307 = arith.muli %arg3, %c4_i32_289 : i32
      %c1_i32_290 = arith.constant 1 : i32
      %308 = arith.addi %307, %c1_i32_290 : i32
      %c0_291 = arith.constant 0 : index
      %c2_292 = arith.constant 2 : index
      %309 = arith.index_cast %308 : i32 to index
      %c12_293 = arith.constant 12 : index
      %310 = vector.load %arg1[%c0_291, %c2_292, %309, %c12_293] : memref<1x4x16x16xf32, #tpu.memory_space<vmem>>, vector<1x1x1x4xf32>
      %311 = vector.shape_cast %310 : vector<1x1x1x4xf32> to vector<1x4xf32>
      %c4_i32_294 = arith.constant 4 : i32
      %312 = arith.muli %arg3, %c4_i32_294 : i32
      %c2_i32_295 = arith.constant 2 : i32
      %313 = arith.addi %312, %c2_i32_295 : i32
      %c0_296 = arith.constant 0 : index
      %c2_297 = arith.constant 2 : index
      %314 = arith.index_cast %313 : i32 to index
      %c12_298 = arith.constant 12 : index
      %315 = vector.load %arg1[%c0_296, %c2_297, %314, %c12_298] : memref<1x4x16x16xf32, #tpu.memory_space<vmem>>, vector<1x1x1x4xf32>
      %316 = vector.shape_cast %315 : vector<1x1x1x4xf32> to vector<1x4xf32>
      %c4_i32_299 = arith.constant 4 : i32
      %317 = arith.muli %arg3, %c4_i32_299 : i32
      %c3_i32_300 = arith.constant 3 : i32
      %318 = arith.addi %317, %c3_i32_300 : i32
      %c0_301 = arith.constant 0 : index
      %c2_302 = arith.constant 2 : index
      %319 = arith.index_cast %318 : i32 to index
      %c12_303 = arith.constant 12 : index
      %320 = vector.load %arg1[%c0_301, %c2_302, %319, %c12_303] : memref<1x4x16x16xf32, #tpu.memory_space<vmem>>, vector<1x1x1x4xf32>
      %321 = vector.shape_cast %320 : vector<1x1x1x4xf32> to vector<1x4xf32>
      %c4_i32_304 = arith.constant 4 : i32
      %322 = arith.muli %arg3, %c4_i32_304 : i32
      %c0_i32_305 = arith.constant 0 : i32
      %323 = arith.addi %322, %c0_i32_305 : i32
      %c0_306 = arith.constant 0 : index
      %c3_307 = arith.constant 3 : index
      %324 = arith.index_cast %323 : i32 to index
      %c12_308 = arith.constant 12 : index
      %325 = vector.load %arg1[%c0_306, %c3_307, %324, %c12_308] : memref<1x4x16x16xf32, #tpu.memory_space<vmem>>, vector<1x1x1x4xf32>
      %326 = vector.shape_cast %325 : vector<1x1x1x4xf32> to vector<1x4xf32>
      %c4_i32_309 = arith.constant 4 : i32
      %327 = arith.muli %arg3, %c4_i32_309 : i32
      %c1_i32_310 = arith.constant 1 : i32
      %328 = arith.addi %327, %c1_i32_310 : i32
      %c0_311 = arith.constant 0 : index
      %c3_312 = arith.constant 3 : index
      %329 = arith.index_cast %328 : i32 to index
      %c12_313 = arith.constant 12 : index
      %330 = vector.load %arg1[%c0_311, %c3_312, %329, %c12_313] : memref<1x4x16x16xf32, #tpu.memory_space<vmem>>, vector<1x1x1x4xf32>
      %331 = vector.shape_cast %330 : vector<1x1x1x4xf32> to vector<1x4xf32>
      %c4_i32_314 = arith.constant 4 : i32
      %332 = arith.muli %arg3, %c4_i32_314 : i32
      %c2_i32_315 = arith.constant 2 : i32
      %333 = arith.addi %332, %c2_i32_315 : i32
      %c0_316 = arith.constant 0 : index
      %c3_317 = arith.constant 3 : index
      %334 = arith.index_cast %333 : i32 to index
      %c12_318 = arith.constant 12 : index
      %335 = vector.load %arg1[%c0_316, %c3_317, %334, %c12_318] : memref<1x4x16x16xf32, #tpu.memory_space<vmem>>, vector<1x1x1x4xf32>
      %336 = vector.shape_cast %335 : vector<1x1x1x4xf32> to vector<1x4xf32>
      %c4_i32_319 = arith.constant 4 : i32
      %337 = arith.muli %arg3, %c4_i32_319 : i32
      %c3_i32_320 = arith.constant 3 : i32
      %338 = arith.addi %337, %c3_i32_320 : i32
      %c0_321 = arith.constant 0 : index
      %c3_322 = arith.constant 3 : index
      %339 = arith.index_cast %338 : i32 to index
      %c12_323 = arith.constant 12 : index
      %340 = vector.load %arg1[%c0_321, %c3_322, %339, %c12_323] : memref<1x4x16x16xf32, #tpu.memory_space<vmem>>, vector<1x1x1x4xf32>
      %341 = vector.shape_cast %340 : vector<1x1x1x4xf32> to vector<1x4xf32>
      %342 = tpu.concatenate %266, %271, %276, %281, %286, %291, %296, %301, %306, %311, %316, %321, %326, %331, %336, %341 in 1 : vector<1x4xf32>, vector<1x4xf32>, vector<1x4xf32>, vector<1x4xf32>, vector<1x4xf32>, vector<1x4xf32>, vector<1x4xf32>, vector<1x4xf32>, vector<1x4xf32>, vector<1x4xf32>, vector<1x4xf32>, vector<1x4xf32>, vector<1x4xf32>, vector<1x4xf32>, vector<1x4xf32>, vector<1x4xf32> -> vector<1x64xf32>
      %c4_i32_324 = arith.constant 4 : i32
      %343 = arith.muli %arg3, %c4_i32_324 : i32
      %c3_i32_325 = arith.constant 3 : i32
      %344 = arith.addi %343, %c3_i32_325 : i32
      %c0_326 = arith.constant 0 : index
      %345 = arith.index_cast %344 : i32 to index
      %c0_327 = arith.constant 0 : index
      %346 = vector.load %arg2[%c0_326, %345, %c0_327] : memref<1x16x64xf32, #tpu.memory_space<vmem>>, vector<1x1x64xf32>
      %347 = vector.shape_cast %346 : vector<1x1x64xf32> to vector<1x64xf32>
      %348 = vector.shape_cast %342 : vector<1x64xf32> to vector<1x1x64xf32>
      tpu.vector_store %arg2[%c0_326, %345, %c0_327], %348 {strides = array<i32>} : memref<1x16x64xf32, #tpu.memory_space<vmem>>, vector<1x1x64xf32>,
    }
    %c4_i32_0 = arith.constant 4 : i32
    return
  }
  func.func @transform_0(%arg0: i32) -> (i32, i32, i32, i32) {
    %c0_i32 = arith.constant 0 : i32
    %c0_i32_0 = arith.constant 0 : i32
    %c0_i32_1 = arith.constant 0 : i32
    %c0_i32_2 = arith.constant 0 : i32
    return %arg0, %c0_i32, %c0_i32_0, %c0_i32_1 : i32, i32, i32, i32
  }
  func.func @transform_1(%arg0: i32) -> (i32, i32, i32) {
    %c0_i32 = arith.constant 0 : i32
    %c0_i32_0 = arith.constant 0 : i32
    %c0_i32_1 = arith.constant 0 : i32
    return %arg0, %c0_i32, %c0_i32_0 : i32, i32, i32
  }
}

</mosaic_0001>

<bundles_post_ra>
// kernel: tpu_custom_call.1
= control target key start
LH: loop header
LB: loop body
LE: loop exit
PB: predicated region body
PF: predicated region fallthrough
CT: control target
= control target key end

     0   :  { %6 = vsyncpa [#allocation3], 0  ;;  %s1400_s0 = inlined_call_operand.hbm [shape: f32[2,4,16,16], index: 0, kind: input, shape index: {}]   ;;  %s1401_s1 = inlined_call_operand.hbm [shape: f32[2,16,64], index: 1, kind: output, shape index: {}]  }
   0x1   :  { %8 = vsyncpa [#allocation3 + $0x1], 0 }
   0x2   :  { %9 = vsyncpa [#allocation4], 0 }
   0x3   :  { %11 = vsyncpa [#allocation4 + $0x1], 0  ;;  %s1025_s6 = smov 0   ;;  %s1027_s7 = smov 0  }
   0x4   :  { %s1029_s8 = smov 0   ;;  %s1031_s9 = smov 0  }
   0x5 LB: > { %s1046_s10 = sadd.s32 4294967295, %s985_s9   ;;  %s711_s11 = sadd.s32 4294967294, %s985_s9   ;;  %s985_s9 = sphi %s1031_s9, %s1421_s9   ;;  %s981_s8 = sphi %s1029_s8, %s1420_s8   ;;  %s977_s7 = sphi %s1027_s7, %s1419_s7   ;;  %s973_s6 = sphi %s1025_s6, %s1418_s6  }
   0x6   : > { %s1050_s12 = sadd.s32 1, %s985_s9   ;;  %s24_s13 = sadd.s32 1, %s981_s8 }
   0x7   : > { %s21_s14 = ssub.s32 %s985_s9, %s1050_s12  ;;  %p31_p0 = scmp.ne.s32.totalorder %s981_s8, %s977_s7 }
   0x8   : > { %p22_p1 = scmp.eq.s32.totalorder %s21_s14, 0  ;;  %p32_p2 = scmp.eq.s32.totalorder %s985_s9, 0 }
   0x9   : > { %p37_p3 = scmp.ne.s32.totalorder %s977_s7, %s973_s6  ;;  %p38_p4 = scmp.eq.s32.totalorder %s1046_s10, 0 }
   0xa   : > { %s1062_s15 = scalar_select %p22_p1, %s981_s8, %s24_s13  }
   0xb   : > { %p1064_p5 = por %p32_p2, %p31_p0  ;;  %p1068_p6 = por %p38_p4, %p37_p3 }
   0xc   : > { %p61_p7 = scmp.eq.s32.totalorder %s1046_s10, 1  ;;  %p67_p8 = scmp.eq.s32.totalorder %s711_s11, 1 }
   0xd   : > { %p821_p10 = scmp.lt.s32.totalorder %s985_s9, 2  ;;  %s87_s20 = sand.u32 1, %s981_s8  }
   0xe   : > { %p1075_p11 = por %p61_p7, %p31_p0  ;;  %p1079_p12 = por %p67_p8, %p37_p3 }
   0xf   : > { %s807_s21 = sshll.u32 %s985_s9, 10  ;;  %s714_s22 = sshll.u32 %s87_s20, 6 }
  0x10   : > { %s1409_s18 = scalar_select %p1075_p11, 1, 0 }
  0x11   : > { %s1410_s19 = scalar_select %p1079_p12, 1, 0 }
  0x12   : > { %s1088_s25 = scalar_lea.hbm %s1400_s0, %s807_s21  ;;  %s91_s26 = scalar_lea.vmem [#allocation2], %s714_s22 }
  0x13   : > { %s98_s27 = sshll.u32 %s91_s26, 4  ;;  %p1092_p13 = pnand %p821_p10, %p1064_p5  ;;  %s1096_s27 = int_to_ptr.vmem [resolvable:$true] %s98_s27 }
  0x14   : > { %s1098_s29 = scalar_lea.sflag [#allocation3], %s87_s20  ;;  %s885_s30 = scalar_lea.hbm %s1088_s25, 1024 }
  0x15   : > { %p886_p0 = scmp.ne.s32.totalorder %s1088_s25, %s885_s30  ;;  %p887_p1 = pneg %p1092_p13 }
  0x16   : > { %s890_s4 = scalar_lea.hbm %s1400_s0, 2048  ;;  %p891_p4 = scmp.lt.u32.totalorder %s1088_s25, %s1400_s0 }
  0x17   : > { %p888_p2 = pnand %p887_p1, %p886_p0  ;;  %p892_p5 = scmp.lt.u32.totalorder %s890_s4, %s885_s30 }
  0x18   : > { %p894_p8 = scmp.lt.u32.totalorder %s885_s30, %s1088_s25 }
  0x19   : > { %p889_p3 = pneg %p888_p2  ;;  %p893_p7 = por %p892_p5, %p891_p4 }
  0x1b   : > { %p895_p10 = por %p894_p8, %p893_p7 }
  0x1d   : > { %p896_p9 = pnand %p895_p10, %p889_p3 }
  0x1f   : > { %899 = shalt.err (!%p896_p9)
}
  0x20   : > { %s900_s13 = scalar_lea.vmem %s1096_s27, 1024  ;;  %s991_s14 = smov [#allocation2]  }
  0x21   : > { %p901_p0 = scmp.ne.s32.totalorder %s1096_s27, %s900_s13  ;;  %s905_s16 = sshll.u32 %s991_s14, 4  ;;  %s906_s16 = int_to_ptr.vmem [resolvable:$false] %s905_s16 }
  0x22   : > { %s907_s20 = scalar_lea.vmem %s906_s16, 2048  ;;  %p908_p11 = scmp.lt.s32.totalorder %s1096_s27, %s906_s16 }
  0x23   : > { %p903_p2 = pnand %p901_p0, %p887_p1  ;;  %p909_p4 = scmp.lt.s32.totalorder %s907_s20, %s900_s13 }
  0x25   : > { %p904_p12 = pneg %p903_p2  ;;  %p910_p5 = por %p909_p4, %p908_p11 }
  0x27   : > { %p911_p7 = pnand %p910_p5, %p904_p12 }
  0x29   : > { %914 = shalt.err (!%p911_p7)
}
  0x2a   : > { %s992_s21 = smov 128   ;;  %s993_s22 = smov 8  }
  0x2b   : > { %816 = dma.hbm_to_vmem [thread:$0]  (!%p1092_p13), %s1088_s25, 1024, %s1096_s27, %s1098_s29, %s992_s21, %s992_s21, %s993_s22  }
  0x2c   : > { %p717_p9 = scmp.ge.s32.totalorder %s985_s9, 1  ;;  %p106_p1 = scmp.lt.s32.totalorder %s985_s9, 3 }
  0x2e   : > { %p107_p3 = pnand %p717_p9, %p106_p1 }
  0x2f   : > { %s1129_s23 = sand.u32 (!%p107_p3), 1, %s977_s7  }
  0x30   : > { %110 = sbr.rel (%p107_p3) target bundleno = 308 (0x134), region = 24  ;;  %s718_s24 = sshll.u32 (!%p107_p3), %s1129_s23, 6 }
  0x31   : > { %s113_s26 = scalar_lea.sflag (!%p107_p3), [#allocation3], %s1129_s23  ;;  %s1133_s30 = scalar_lea.vmem (!%p107_p3), [#allocation2], %s718_s24 }
  0x37   : > { %964 = dma.done.wait (%p1068_p6), %s113_s26, 1024  }
  0x38   : > { %966 = vsyncadd (%p1068_p6), %s113_s26, 4294966272  ;;  %s719_s25 = sshll.u32 %s1129_s23, 4  ;;  %s1142_s28 = smov 0  }
  0x39   : > { %s1140_s27 = scalar_lea.vmem [#allocation5], %s719_s25 }
  0x3a LB: >> { %s1403_s29 = sshll.u32 %s989_s28, 2  ;;  %s994_s17 = smov 12   ;;  %vm249_vm0 = vcmask 31744   ;;  %vm251_vm1 = vcmask 64512   ;;  %vm253_vm2 = vcmask 97280   ;;  %vm255_vm3 = vcmask 130048   ;;  %s989_s28 = sphi %s1142_s28, %s140_s28  }
  0x3b   : >> { %s1151_s2 = scalar_lea.vmem %s1133_s30, %s1403_s29 [#allocation2]  ;;  %s995_s3 = smov 4   ;;  %vm257_vm4 = vcmask 162816   ;;  %vm259_vm5 = vcmask 195584   ;;  %vm261_vm6 = vcmask 228352   ;;  %vm263_vm7 = vcmask 261120  }
  0x3c   : >> { %v726_v0 = vld [vmem:[%s1151_s2 + $0x3] sm:$0x1]  ;;  %v722_v1 = vld [vmem:[%s1151_s2 + $0x1] sm:$0x1]  ;;  %v728_v2 = vld [vmem:[%s1151_s2 + $0x10] sm:$0x1] }
  0x3d   : >> { %198 = vrot.lane.b32.xlu1 %v726_v0, %s994_s17  ;;  %190 = vrot.lane.b32.xlu0 %v722_v1, %s995_s3  ;;  %v724_v3 = vld [vmem:[%s1151_s2 + $0x2] sm:$0x1]  ;;  %s996_s4 = smov 16   ;;  %s997_s5 = smov 8   ;;  %v732_v4 = vld [vmem:[%s1151_s2 + $0x12] sm:$0x1] }
  0x3e   : >> { %v730_v5 = vld [vmem:[%s1151_s2 + $0x11] sm:$0x1]  ;;  %s998_s11 = smov 24   ;;  %s999_s13 = smov 20   ;;  %v736_v6 = vld [vmem:[%s1151_s2 + $0x20] sm:$0x1] }
  0x3f   : >> { %v734_v7 = vld [vmem:[%s1151_s2 + $0x13] sm:$0x1]  ;;  %s1000_s14 = smov 32   ;;  %s1001_s16 = smov 28   ;;  %v740_v8 = vld [vmem:[%s1151_s2 + $0x22] sm:$0x1] }
  0x40   : >> { %v738_v9 = vld [vmem:[%s1151_s2 + $0x21] sm:$0x1]  ;;  %s1002_s20 = smov 40   ;;  %s1003_s21 = smov 36   ;;  %v744_v10 = vld [vmem:[%s1151_s2 + $0x30] sm:$0x1] }
  0x41   : >> { %202 = vrot.lane.b32.xlu1 %v728_v2, %s996_s4  ;;  %194 = vrot.lane.b32.xlu0 %v724_v3, %s997_s5  ;;  %v742_v11 = vld [vmem:[%s1151_s2 + $0x23] sm:$0x1]  ;;  %s1404_s22 = smov 48   ;;  %s1005_s24 = smov 44   ;;  %v748_v12 = vld [vmem:[%s1151_s2 + $0x32] sm:$0x1] }
  0x42   : >> { %v746_v13 = vld [vmem:[%s1151_s2 + $0x31] sm:$0x1]  ;;  %s1406_s26 = smov 56   ;;  %s1007_s25 = smov 52   ;;  %v282_v14 = vld [vmem:[%s1151_s2] sm:$0x1] }
  0x43   : >> { %v750_v15 = vld [vmem:[%s1151_s2 + $0x33] sm:$0x1]  ;;  %s1008_s29 = smov 124   ;;  %v753_v16 = vld [vmem:[%s1151_s2 + $0x3] sm:$0x1]  ;;  %vm265_vm8 = vcmask 293888  }
  0x44   : >> { %v752_v17 = vld [vmem:[%s1151_s2 + $0x2] sm:$0x1]  ;;  %v755_v18 = vld [vmem:[%s1151_s2 + $0x11] sm:$0x1]  ;;  %v754_v19 = vld [vmem:[%s1151_s2 + $0x10] sm:$0x1] }
  0x45   : >> { %210 = vrot.lane.b32.xlu1 %v732_v4, %s998_s11  ;;  %206 = vrot.lane.b32.xlu0 %v730_v5, %s999_s13  ;;  %v757_v20 = vld [vmem:[%s1151_s2 + $0x13] sm:$0x1]  ;;  %v756_v21 = vld [vmem:[%s1151_s2 + $0x12] sm:$0x1]  ;;  %vm267_vm9 = vcmask 326656   ;;  %vm269_vm10 = vcmask 359424  }
  0x46   : >> { %v759_v22 = vld [vmem:[%s1151_s2 + $0x21] sm:$0x1]  ;;  %v758_v23 = vld [vmem:[%s1151_s2 + $0x20] sm:$0x1]  ;;  %v770_v28 = vld [vmem:[%s1151_s2 + $0x3] sm:$0x1] }
  0x47   : >> { %v768_v24 = vld [vmem:[%s1151_s2 + $0x1] sm:$0x1]  ;;  %v375_v25 = vld [vmem:[%s1151_s2] sm:$0x1]  ;;  %v786_v29 = vld [vmem:[%s1151_s2 + $0x2] sm:$0x1] }
  0x48   : >> { %v785_v26 = vld [vmem:[%s1151_s2 + $0x1] sm:$0x1]  ;;  %v468_v27 = vld [vmem:[%s1151_s2] sm:$0x1]  ;;  %v788_v30 = vld [vmem:[%s1151_s2 + $0x10] sm:$0x1] }
  0x49   : >> { %218 = vrot.lane.b32.xlu1 %v736_v6, %s1000_s14  ;;  %214 = vrot.lane.b32.xlu0 %v734_v7, %s1001_s16  ;;  %v771_v31 = vld [vmem:[%s1151_s2 + $0x10] sm:$0x1]  ;;  %v789_v32 = vld [vmem:[%s1151_s2 + $0x11] sm:$0x1]  ;;  %vm271_vm11 = vcmask 392192   ;;  %vm273_vm12 = vcmask 424960  }
  0x4a   : >> { %v772_v33 = vld [vmem:[%s1151_s2 + $0x11] sm:$0x1]  ;;  %v790_v34 = vld [vmem:[%s1151_s2 + $0x12] sm:$0x1]  ;;  %v791_v36 = vld [vmem:[%s1151_s2 + $0x13] sm:$0x1] }
  0x4b   : >> { %v773_v35 = vld [vmem:[%s1151_s2 + $0x12] sm:$0x1]  ;;  %v774_v37 = vld [vmem:[%s1151_s2 + $0x13] sm:$0x1]  ;;  %v792_v38 = vld [vmem:[%s1151_s2 + $0x20] sm:$0x1] }
  0x4c   : >> { %v775_v39 = vld [vmem:[%s1151_s2 + $0x20] sm:$0x1]  ;;  %v793_v40 = vld [vmem:[%s1151_s2 + $0x21] sm:$0x1]  ;;  %v777_v42 = vld [vmem:[%s1151_s2 + $0x22] sm:$0x1] }
  0x4d   : >> { %226 = vrot.lane.b32.xlu1 %v740_v8, %s1002_s20  ;;  %222 = vrot.lane.b32.xlu0 %v738_v9, %s1003_s21  ;;  %v776_v41 = vld [vmem:[%s1151_s2 + $0x21] sm:$0x1]  ;;  %v760_v43 = vld [vmem:[%s1151_s2 + $0x22] sm:$0x1]  ;;  %vm275_vm13 = vcmask 457728   ;;  %vm277_vm14 = vcmask 490496  }
  0x4e   : >> { %v761_v44 = vld [vmem:[%s1151_s2 + $0x23] sm:$0x1]  ;;  %v794_v45 = vld [vmem:[%s1151_s2 + $0x22] sm:$0x1]  ;;  %v779_v48 = vld [vmem:[%s1151_s2 + $0x30] sm:$0x1] }
  0x4f   : >> { %v795_v46 = vld [vmem:[%s1151_s2 + $0x23] sm:$0x1]  ;;  %v762_v49 = vld [vmem:[%s1151_s2 + $0x30] sm:$0x1]  ;;  %v763_v50 = vld [vmem:[%s1151_s2 + $0x31] sm:$0x1] }
  0x50   : >> { %v778_v47 = vld [vmem:[%s1151_s2 + $0x23] sm:$0x1]  ;;  %v796_v51 = vld [vmem:[%s1151_s2 + $0x30] sm:$0x1]  ;;  %v797_v52 = vld [vmem:[%s1151_s2 + $0x31] sm:$0x1] }
  0x51   : >> { %234 = vrot.lane.b32.xlu1 %v744_v10, %s1404_s22  ;;  %230 = vrot.lane.b32.xlu0 %v742_v11, %s1005_s24  ;;  %s1009_s22 = smov 60   ;;  %v780_v53 = vld [vmem:[%s1151_s2 + $0x31] sm:$0x1]  ;;  %v781_v54 = vld [vmem:[%s1151_s2 + $0x32] sm:$0x1]  ;;  %vm280_vm15 = vcmask 516096  }
  0x52   : >> { %v764_v55 = vld [vmem:[%s1151_s2 + $0x32] sm:$0x1]  ;;  %v765_v56 = vld [vmem:[%s1151_s2 + $0x33] sm:$0x1]  ;;  %v143_v62 = vld [vmem:[%s1151_s2] sm:$0x1] }
  0x53   : >> { %v798_v57 = vld [vmem:[%s1151_s2 + $0x32] sm:$0x1]  ;;  %v799_v58 = vld [vmem:[%s1151_s2 + $0x33] sm:$0x1] }
  0x54   : >> { %v782_v59 = vld [vmem:[%s1151_s2 + $0x33] sm:$0x1] }
  0x55   : >> { %242 = vrot.lane.b32.xlu1 %v748_v12, %s1406_s26  ;;  %238 = vrot.lane.b32.xlu0 %v746_v13, %s1007_s25  ;;  %s1011_s26 = smov 116  }
  0x59   : >> { %299 = vrot.lane.b32.xlu1 %v282_v14, %s1008_s29  ;;  %246 = vrot.lane.b32.xlu0 %v750_v15, %s1009_s22  ;;  %s1010_s22 = smov 120  }
  0x5d   : >> { %307 = vrot.lane.b32.xlu1 %v753_v16, %s997_s5  ;;  %303 = vrot.lane.b32.xlu0 %v752_v17, %s995_s3 }
  0x61   : >> { %315 = vrot.lane.b32.xlu1 %v755_v18, %s996_s4  ;;  %311 = vrot.lane.b32.xlu0 %v754_v19, %s994_s17 }
  0x65   : >> { %323 = vrot.lane.b32.xlu1 %v757_v20, %s998_s11  ;;  %319 = vrot.lane.b32.xlu0 %v756_v21, %s999_s13 }
  0x69   : >> { %331 = vrot.lane.b32.xlu1 %v759_v22, %s1000_s14  ;;  %327 = vrot.lane.b32.xlu0 %v758_v23, %s1001_s16 }
  0x6d   : >> { %396 = vrot.lane.b32.xlu1 %v768_v24, %s1008_s29  ;;  %392 = vrot.lane.b32.xlu0 %v375_v25, %s1010_s22  ;;  %v751_v24 = vld [vmem:[%s1151_s2 + $0x1] sm:$0x1] }
  0x71   : >> { %489 = vrot.lane.b32.xlu1 %v785_v26, %s1010_s22  ;;  %485 = vrot.lane.b32.xlu0 %v468_v27, %s1011_s26 }
  0x75   : >> { %400 = vrot.lane.b32.xlu1 %v770_v28, %s995_s3  ;;  %493 = vrot.lane.b32.xlu0 %v786_v29, %s1008_s29  ;;  %s1412_s29 = smov 48  }
  0x79   : >> { %497 = vrot.lane.b32.xlu1 %v788_v30, %s995_s3  ;;  %404 = vrot.lane.b32.xlu0 %v771_v31, %s997_s5  ;;  %s1414_s3 = sshll.u32 %s989_s28, 2  ;;  %s140_s28 = sadd.s32 1, %s989_s28  }
  0x7a   : >> { %p137_p6 = scmp.ge.s32.totalorder %s140_s28, 4  }
  0x7b   : > { %p1415_p12 = scmp.ne.s32.totalorder (%p137_p6), %s1409_s18, 0  ;;  %s1012_s30 = smov (%p137_p6), [#allocation5]  }
  0x7c   : > { %s919_s28 = sshll.u32 (%p137_p6), %s1012_s30, 4  ;;  %s920_s28 = int_to_ptr.vmem [resolvable:$false] %s919_s28 }
  0x7d   : >> { %501 = vrot.lane.b32.xlu1 %v789_v32, %s997_s5  ;;  %408 = vrot.lane.b32.xlu0 %v772_v33, %s994_s17 }
  0x81   : >> { %505 = vrot.lane.b32.xlu1 %v790_v34, %s994_s17  ;;  %412 = vrot.lane.b32.xlu0 %v773_v35, %s996_s4  ;;  %s1413_s17 = smov 56  }
  0x85   : >> { %509 = vrot.lane.b32.xlu1 %v791_v36, %s996_s4  ;;  %416 = vrot.lane.b32.xlu0 %v774_v37, %s999_s13  ;;  %s1287_s4 = scalar_lea.vmem %s1140_s27, %s1414_s3 [#allocation5] }
  0x89   : >> { %513 = vrot.lane.b32.xlu1 %v792_v38, %s999_s13  ;;  %420 = vrot.lane.b32.xlu0 %v775_v39, %s998_s11 }
  0x8d   : >> { %517 = vrot.lane.b32.xlu1 %v793_v40, %s998_s11  ;;  %424 = vrot.lane.b32.xlu0 %v776_v41, %s1001_s16 }
  0x91   : >> { %428 = vrot.lane.b32.xlu1 %v777_v42, %s1000_s14  ;;  %335 = vrot.lane.b32.xlu0 %v760_v43, %s1003_s21 }
  0x95   : >> { %339 = vrot.lane.b32.xlu1 %v761_v44, %s1002_s20  ;;  %521 = vrot.lane.b32.xlu0 %v794_v45, %s1001_s16  ;;  %s562_s16 = scalar_lea.sflag (%p137_p6), [#allocation4], %s1129_s23 }
  0x99   : >> { %525 = vrot.lane.b32.xlu1 %v795_v46, %s1000_s14  ;;  %432 = vrot.lane.b32.xlu0 %v778_v47, %s1003_s21  ;;  %v769_v46 = vld [vmem:[%s1151_s2 + $0x2] sm:$0x1]  ;;  %s575_s14 = sshll.u32 (%p137_p6), %s1140_s27, 4  ;;  %s1356_s14 = int_to_ptr.vmem [resolvable:$true] %s575_s14 }
  0x9a   : > { %p922_p10 = scmp.lt.s32.totalorder (%p137_p6), %s1356_s14, %s920_s28 }
  0x9d   : >> { %436 = vrot.lane.b32.xlu1 %v779_v48, %s1002_s20  ;;  %343 = vrot.lane.b32.xlu0 %v762_v49, %s1005_s24 }
  0xa1   : >> { %347 = vrot.lane.b32.xlu1 %v763_v50, %s1412_s29  ;;  %529 = vrot.lane.b32.xlu0 %v796_v51, %s1003_s21 }
  0xa5   : >> { %533 = vrot.lane.b32.xlu1 %v797_v52, %s1002_s20  ;;  %440 = vrot.lane.b32.xlu0 %v780_v53, %s1005_s24  ;;  %v787_v53 = vld [vmem:[%s1151_s2 + $0x3] sm:$0x1]  ;;  %s808_s2 = sshll.u32 (%p137_p6), %s1046_s10, 8  ;;  %s915_s20 = scalar_lea.vmem (%p137_p6), %s1356_s14, 256 }
  0xa6   : > { %s1353_s13 = scalar_lea.hbm (%p137_p6), %s1401_s1, %s808_s2  ;;  %p916_p11 = scmp.ne.s32.totalorder (%p137_p6), %s1356_s14, %s915_s20 }
  0xa7   : > { %s921_s10 = scalar_lea.vmem (%p137_p6), %s920_s28, 512 }
  0xa8   : > { %p917_p13 = pnand (%p137_p6), %p916_p11, %p1415_p12  ;;  %p923_p0 = scmp.lt.s32.totalorder (%p137_p6), %s921_s10, %s915_s20 }
  0xa9   : >> { %444 = vrot.lane.b32.xlu1 %v781_v54, %s1412_s29  ;;  %351 = vrot.lane.b32.xlu0 %v764_v55, %s1007_s25 }
  0xaa   : > { %p918_p8 = pneg (%p137_p6), %p917_p13  ;;  %p924_p2 = por (%p137_p6), %p923_p0, %p922_p10 }
  0xac   : > { %p925_p4 = pnand (%p137_p6), %p924_p2, %p918_p8 }
  0xad   : >> { %355 = vrot.lane.b32.xlu1 %v765_v56, %s1413_s17  ;;  %537 = vrot.lane.b32.xlu0 %v798_v57, %s1005_s24 }
  0xaf   : >> { %v199_v60 = vpop.permute.xlu1 %198  ;;  %v191_v61 = vpop.permute.xlu0 %190 }
  0xb0   : >> { %v250_v63 = vsel %vm249_vm0, %v143_v62, %v191_v61 }
  0xb1   : >> { %541 = vrot.lane.b32.xlu1 %v799_v58, %s1412_s29  ;;  %448 = vrot.lane.b32.xlu0 %v782_v59, %s1007_s25 }
  0xb3   : >> { %v203_v0 = vpop.permute.xlu1 %202  ;;  %v195_v1 = vpop.permute.xlu0 %194 }
  0xb4   : >> { %v252_v2 = vsel %vm251_vm1, %v250_v63, %v195_v1 }
  0xb5   : >> { %v254_v3 = vsel %vm253_vm2, %v252_v2, %v199_v60 }
  0xb6   : >> { %v256_v4 = vsel %vm255_vm3, %v254_v3, %v203_v0 }
  0xb7   : >> { %v211_v5 = vpop.permute.xlu1 %210  ;;  %v207_v6 = vpop.permute.xlu0 %206 }
  0xb8   : >> { %v258_v7 = vsel %vm257_vm4, %v256_v4, %v207_v6 }
  0xb9   : >> { %v260_v10 = vsel %vm259_vm5, %v258_v7, %v211_v5 }
  0xbb   : >> { %v219_v8 = vpop.permute.xlu1 %218  ;;  %v215_v9 = vpop.permute.xlu0 %214 }
  0xbc   : >> { %v262_v11 = vsel %vm261_vm6, %v260_v10, %v215_v9 }
  0xbd   : >> { %v264_v14 = vsel %vm263_vm7, %v262_v11, %v219_v8 }
  0xbf   : >> { %v227_v12 = vpop.permute.xlu1 %226  ;;  %v223_v13 = vpop.permute.xlu0 %222 }
  0xc0   : >> { %v266_v15 = vsel %vm265_vm8, %v264_v14, %v223_v13 }
  0xc1   : >> { %v268_v18 = vsel %vm267_vm9, %v266_v15, %v227_v12 }
  0xc3   : >> { %v235_v16 = vpop.permute.xlu1 %234  ;;  %v231_v17 = vpop.permute.xlu0 %230 }
  0xc4   : >> { %v270_v19 = vsel %vm269_vm10, %v268_v18, %v231_v17 }
  0xc5   : >> { %v272_v22 = vsel %vm271_vm11, %v270_v19, %v235_v16 }
  0xc7   : >> { %v243_v20 = vpop.permute.xlu1 %242  ;;  %v239_v21 = vpop.permute.xlu0 %238 }
  0xc8   : >> { %v274_v23 = vsel %vm273_vm12, %v272_v22, %v239_v21 }
  0xc9   : >> { %v276_v27 = vsel %vm275_vm13, %v274_v23, %v243_v20 }
  0xcb   : >> { %v300_v25 = vpop.permute.xlu1 %299  ;;  %v247_v26 = vpop.permute.xlu0 %246 }
  0xcc   : >> { %v358_v28 = vsel %vm249_vm0, %v300_v25, %v751_v24  ;;  %v278_v29 = vsel %vm277_vm14, %v276_v27, %v247_v26 }
  0xcd   : >> { %281 = vst.msk [vmem:[%s1287_s4] sm:$0x1] %vm280_vm15, %v278_v29 }
  0xcf   : >> { %v308_v30 = vpop.permute.xlu1 %307  ;;  %v304_v31 = vpop.permute.xlu0 %303 }
  0xd0   : >> { %v359_v32 = vsel %vm251_vm1, %v358_v28, %v304_v31 }
  0xd1   : >> { %v360_v33 = vsel %vm253_vm2, %v359_v32, %v308_v30 }
  0xd3   : >> { %v316_v34 = vpop.permute.xlu1 %315  ;;  %v312_v35 = vpop.permute.xlu0 %311 }
  0xd4   : >> { %v361_v36 = vsel %vm255_vm3, %v360_v33, %v312_v35 }
  0xd5   : >> { %v362_v37 = vsel %vm257_vm4, %v361_v36, %v316_v34 }
  0xd7   : >> { %v324_v38 = vpop.permute.xlu1 %323  ;;  %v320_v39 = vpop.permute.xlu0 %319 }
  0xd8   : >> { %v363_v40 = vsel %vm259_vm5, %v362_v37, %v320_v39 }
  0xd9   : >> { %v364_v41 = vsel %vm261_vm6, %v363_v40, %v324_v38 }
  0xdb   : >> { %v332_v42 = vpop.permute.xlu1 %331  ;;  %v328_v43 = vpop.permute.xlu0 %327 }
  0xdc   : >> { %v365_v44 = vsel %vm263_vm7, %v364_v41, %v328_v43 }
  0xdd   : >> { %v366_v45 = vsel %vm265_vm8, %v365_v44, %v332_v42 }
  0xdf   : >> { %v397_v47 = vpop.permute.xlu1 %396  ;;  %v393_v48 = vpop.permute.xlu0 %392 }
  0xe0   : >> { %v451_v49 = vsel %vm249_vm0, %v393_v48, %v397_v47 }
  0xe1   : >> { %v452_v50 = vsel %vm251_vm1, %v451_v49, %v769_v46 }
  0xe3   : >> { %v490_v51 = vpop.permute.xlu1 %489  ;;  %v486_v52 = vpop.permute.xlu0 %485 }
  0xe4   : >> { %v544_v54 = vsel %vm249_vm0, %v486_v52, %v490_v51 }
  0xe7   : >> { %v401_v55 = vpop.permute.xlu1 %400  ;;  %v494_v56 = vpop.permute.xlu0 %493 }
  0xe8   : >> { %v453_v57 = vsel %vm253_vm2, %v452_v50, %v401_v55  ;;  %v545_v58 = vsel %vm251_vm1, %v544_v54, %v494_v56 }
  0xe9   : >> { %v546_v59 = vsel %vm253_vm2, %v545_v58, %v787_v53 }
  0xeb   : >> { %v498_v60 = vpop.permute.xlu1 %497  ;;  %v405_v61 = vpop.permute.xlu0 %404 }
  0xec   : >> { %v547_v62 = vsel %vm255_vm3, %v546_v59, %v498_v60  ;;  %v454_v63 = vsel %vm255_vm3, %v453_v57, %v405_v61 }
  0xef   : >> { %v502_v0 = vpop.permute.xlu1 %501  ;;  %v409_v1 = vpop.permute.xlu0 %408 }
  0xf0   : >> { %v548_v2 = vsel %vm257_vm4, %v547_v62, %v502_v0  ;;  %v455_v3 = vsel %vm257_vm4, %v454_v63, %v409_v1 }
  0xf3   : >> { %v506_v4 = vpop.permute.xlu1 %505  ;;  %v413_v5 = vpop.permute.xlu0 %412 }
  0xf4   : >> { %v549_v6 = vsel %vm259_vm5, %v548_v2, %v506_v4  ;;  %v456_v7 = vsel %vm259_vm5, %v455_v3, %v413_v5 }
  0xf7   : >> { %v510_v8 = vpop.permute.xlu1 %509  ;;  %v417_v9 = vpop.permute.xlu0 %416 }
  0xf8   : >> { %v550_v10 = vsel %vm261_vm6, %v549_v6, %v510_v8  ;;  %v457_v11 = vsel %vm261_vm6, %v456_v7, %v417_v9 }
  0xfb   : >> { %v514_v12 = vpop.permute.xlu1 %513  ;;  %v421_v13 = vpop.permute.xlu0 %420 }
  0xfc   : >> { %v551_v14 = vsel %vm263_vm7, %v550_v10, %v514_v12  ;;  %v458_v15 = vsel %vm263_vm7, %v457_v11, %v421_v13 }
  0xff   : >> { %v518_v16 = vpop.permute.xlu1 %517  ;;  %v425_v17 = vpop.permute.xlu0 %424 }
 0x100   : >> { %v552_v18 = vsel %vm265_vm8, %v551_v14, %v518_v16  ;;  %v459_v19 = vsel %vm265_vm8, %v458_v15, %v425_v17 }
 0x103   : >> { %v429_v20 = vpop.permute.xlu1 %428  ;;  %v336_v21 = vpop.permute.xlu0 %335 }
 0x104   : >> { %v367_v32 = vsel %vm267_vm9, %v366_v45, %v336_v21  ;;  %v460_v38 = vsel %vm267_vm9, %v459_v19, %v429_v20 }
 0x107   : >> { %v340_v22 = vpop.permute.xlu1 %339  ;;  %v522_v23 = vpop.permute.xlu0 %521 }
 0x108   : >> { %v368_v35 = vsel %vm269_vm10, %v367_v32, %v340_v22  ;;  %v553_v39 = vsel %vm267_vm9, %v552_v18, %v522_v23 }
 0x10b   : >> { %v526_v24 = vpop.permute.xlu1 %525  ;;  %v433_v25 = vpop.permute.xlu0 %432 }
 0x10c   : >> { %v554_v43 = vsel %vm269_vm10, %v553_v39, %v526_v24  ;;  %v461_v44 = vsel %vm269_vm10, %v460_v38, %v433_v25 }
 0x10f   : >> { %v437_v26 = vpop.permute.xlu1 %436  ;;  %v344_v27 = vpop.permute.xlu0 %343 }
 0x110   : >> { %v369_v36 = vsel %vm271_vm11, %v368_v35, %v344_v27  ;;  %v462_v46 = vsel %vm271_vm11, %v461_v44, %v437_v26 }
 0x113   : >> { %v348_v28 = vpop.permute.xlu1 %347  ;;  %v530_v29 = vpop.permute.xlu0 %529 }
 0x114   : >> { %v370_v37 = vsel %vm273_vm12, %v369_v36, %v348_v28  ;;  %v555_v47 = vsel %vm271_vm11, %v554_v43, %v530_v29 }
 0x117   : >> { %v534_v30 = vpop.permute.xlu1 %533  ;;  %v441_v31 = vpop.permute.xlu0 %440 }
 0x118   : >> { %v556_v48 = vsel %vm273_vm12, %v555_v47, %v534_v30  ;;  %v463_v49 = vsel %vm273_vm12, %v462_v46, %v441_v31 }
 0x11b   : >> { %v445_v33 = vpop.permute.xlu1 %444  ;;  %v352_v34 = vpop.permute.xlu0 %351 }
 0x11c   : >> { %v371_v40 = vsel %vm275_vm13, %v370_v37, %v352_v34  ;;  %v464_v50 = vsel %vm275_vm13, %v463_v49, %v445_v33 }
 0x11f   : >> { %v356_v41 = vpop.permute.xlu1 %355  ;;  %v538_v42 = vpop.permute.xlu0 %537  ;;  %139 = sbr.rel (!%p137_p6) target bundleno = 58 (0x3a), region = 96 }
 0x120   : >> { %v372_v45 = vsel %vm277_vm14, %v371_v40, %v356_v41  ;;  %v557_v51 = vsel %vm275_vm13, %v556_v48, %v538_v42 }
 0x121   : >> { %767 = vst.msk [vmem:[%s1287_s4 + $0x1] sm:$0x1] %vm280_vm15, %v372_v45 }
 0x123   : >> { %v542_v52 = vpop.permute.xlu1 %541  ;;  %v449_v53 = vpop.permute.xlu0 %448 }
 0x124   : >> { %v558_v54 = vsel %vm277_vm14, %v557_v51, %v542_v52  ;;  %v465_v55 = vsel %vm277_vm14, %v464_v50, %v449_v53 }
 0x125   : >> { %801 = vst.msk [vmem:[%s1287_s4 + $0x3] sm:$0x1] %vm280_vm15, %v558_v54  ;;  %784 = vst.msk [vmem:[%s1287_s4 + $0x2] sm:$0x1] %vm280_vm15, %v465_v55 }
 0x126   : > { %928 = shalt.err (!%p925_p4)
}
 0x127   : > { %s929_s27 = scalar_lea.hbm %s1353_s13, 256  ;;  %s933_s26 = scalar_lea.hbm %s1401_s1, 512 }
 0x128   : > { %p930_p5 = scmp.ne.s32.totalorder %s1353_s13, %s929_s27  ;;  %p934_p1 = scmp.lt.u32.totalorder %s1353_s13, %s1401_s1 }
 0x129   : > { %p935_p3 = scmp.lt.u32.totalorder %s933_s26, %s929_s27  ;;  %p937_p11 = scmp.lt.u32.totalorder %s929_s27, %s1353_s13 }
 0x12a   : > { %p931_p7 = pnand %p930_p5, %p1415_p12 }
 0x12b   : > { %p936_p6 = por %p935_p3, %p934_p1 }
 0x12c   : > { %p932_p9 = pneg %p931_p7 }
 0x12d   : > { %p938_p13 = por %p937_p11, %p936_p6 }
 0x12f   : > { %p939_p8 = pnand %p938_p13, %p932_p9 }
 0x131   : > { %942 = shalt.err (!%p939_p8)
}
 0x132   : > { %s1013_s29 = smov 128   ;;  %s1014_s17 = smov 8  }
 0x133   : > { %811 = dma.vmem_to_hbm [thread:$0]  (%p1415_p12), %s1356_s14, 256, %s1353_s13, %s562_s16, %s1013_s29, %s1013_s29, %s1014_s17  }
 0x134 PF: > { %s590_s3 = sand.u32 1, %s973_s6   ;;  %p1416_p10 = scmp.ne.s32.totalorder %s1410_s19, 0 }
 0x135   : > { %p1417_p0 = scmp.ge.s32.totalorder %s985_s9, 2  ;;  %s591_s4 = scalar_lea.sflag [#allocation4], %s590_s3 }
 0x137   : > { %p818_p2 = pnand %p1417_p0, %p1416_p10 }
 0x139   : > { %968 = dma.done.wait (!%p818_p2), %s591_s4, 256  }
 0x13a   : > { %970 = vsyncadd (!%p818_p2), %s591_s4, 4294967040  ;;  %p14_p4 = scmp.ge.s32.totalorder %s1050_s12, 4   ;;  %s1418_s6 = smov %s977_s7 }
 0x13b   : > { %s1419_s7 = smov %s981_s8  ;;  %s1420_s8 = smov %s1062_s15 }
 0x13c   : > { %s1421_s9 = smov %s1050_s12  ;;  %16 = sbr.rel (!%p14_p4) target bundleno = 5 (0x5), region = 107 }
 0x143   :  { %596 = vsyncpa [#allocation3], 1 }
 0x144   :  { %598 = vsyncpa [#allocation3 + $0x1], 1 }
 0x145   :  { %599 = vsyncpa [#allocation4], 1 }
 0x146   :  { %601 = vsyncpa [#allocation4 + $0x1], 1 }

</bundles_post_ra>
